<compile_context>
chip_gen: v5e
topology: v5e:2x2
jax: 0.10.0
libtpu: 0.0.40
codegen_flags: <defaults>
</compile_context>

<pallas_src>
import jax
import jax.numpy as jnp
from jax.experimental import pallas as pl
from jax.experimental.pallas import tpu as pltpu


_SMALL_BYTES = 512 * 1024                 # <= this: single no-grid block
_TARGET_BLOCK_BYTES = 4 * 1024 * 1024     # ~4 MiB per block
_VMEM_LIMIT_BYTES = 48 * 1024 * 1024      # headroom under v7x 64 MiB physical
_MIN_GRID_BLOCKS = 4                      # >=2 blocks per v7x TensorCore


def _residual_connect_kernel(x_ref, r_ref, o_ref):
    # Elementwise hot path: add + relu on the VPU, all in VMEM.
    o_ref[...] = jnp.maximum(x_ref[...] + r_ref[...], 0)


def _round_up(x, m):
    return ((x + m - 1) // m) * m


def _choose_cols(n):
    """Pick a lane-friendly last dim that exactly divides n (no padding)."""
    # Prefer a multiple of 128 -> unmasked, lane-dense vector stores.
    for k in range(8, 0, -1):
        c = 128 * k
        if n % c == 0:
            return c
    # Ragged n: largest divisor in [128, 2048].  Used as the full last-dim
    # extent (allowed by the (8,128) rule), so no pad / no slice is needed.
    for c in range(min(2048, n), 127, -1):
        if n % c == 0:
            return c
    return None


def residual_connect(inputs, residual, *, alias_inputs=False):
    """relu(inputs + residual) via a lane-dense, tiled Pallas TPU kernel."""
    assert inputs.shape == residual.shape, "shapes must match (no broadcasting)"
    assert inputs.dtype == residual.dtype
    orig_shape = inputs.shape
    n = inputs.size
    if n == 0:
        return jnp.maximum(inputs + residual, 0)

    itemsize = jnp.dtype(inputs.dtype).itemsize
    cols = _choose_cols(n)

    if cols is None:
        # Pathological size (no divisor >= 128, i.e. near-prime n): keep the
        # correct-but-padded fallback.  Only tiny/rare shapes hit this.
        # TODO(synk): could handle the <128-element tail with plain jnp instead.
        cols = 128
        n_pad = _round_up(n, cols)
        rows = n_pad // cols
        x2 = jnp.pad(inputs.reshape(-1), (0, n_pad - n)).reshape(rows, cols)
        r2 = jnp.pad(residual.reshape(-1), (0, n_pad - n)).reshape(rows, cols)
        padded = True
    else:
        rows = n // cols
        # reshape of a contiguous row-major array is a free bitcast in XLA.
        x2 = inputs.reshape(rows, cols)
        r2 = residual.reshape(rows, cols)
        padded = False

    alias = {0: 0} if alias_inputs else {}
    total_bytes = rows * cols * itemsize

    if total_bytes <= _SMALL_BYTES:
        # Small case: one full-array block, no grid -> zero per-step overhead.
        out2 = pl.pallas_call(
            _residual_connect_kernel,
            out_shape=jax.ShapeDtypeStruct((rows, cols), inputs.dtype),
            input_output_aliases=alias,
        )(x2, r2)
    else:
        # Large case: 1-D parallel grid over rows, full lane extent per block.
        # Target ~4 MiB blocks but keep at least _MIN_GRID_BLOCKS blocks so the
        # pipeline overlaps DMA with compute and v7x megacore can split them.
        block_rows_target = max(
            32, (_TARGET_BLOCK_BYTES // (cols * itemsize)) // 32 * 32)
        rows_for_min_blocks = _round_up(
            (rows + _MIN_GRID_BLOCKS - 1) // _MIN_GRID_BLOCKS, 32)
        block_rows = max(32, min(block_rows_target, rows_for_min_blocks))
        grid = ((rows + block_rows - 1) // block_rows,)
        out2 = pl.pallas_call(
            _residual_connect_kernel,
            out_shape=jax.ShapeDtypeStruct((rows, cols), inputs.dtype),
            grid_spec=pl.GridSpec(
                grid=grid,
                in_specs=[
                    pl.BlockSpec((block_rows, cols), lambda i: (i, 0)),
                    pl.BlockSpec((block_rows, cols), lambda i: (i, 0)),
                ],
                out_specs=pl.BlockSpec((block_rows, cols), lambda i: (i, 0)),
            ),
            compiler_params=pltpu.CompilerParams(
                dimension_semantics=("parallel",),
                vmem_limit_bytes=_VMEM_LIMIT_BYTES,
            ),
            input_output_aliases=alias,
        )(x2, r2)

    if padded:
        return out2.reshape(-1)[:n].reshape(orig_shape)
    return out2.reshape(orig_shape)


if __name__ == "__main__":
    key = jax.random.PRNGKey(0)
    k1, k2, k3, k4, k5, k6 = jax.random.split(key, 6)

    # Primary test: small NCHW-like shape consistent with the module's usage.
    B, C, H, W = 2, 4, 16, 16
    inputs = jax.random.normal(k1, (B, C, H, W), dtype=jnp.float32)
    residual = jax.random.normal(k2, (B, C, H, W), dtype=jnp.float32)
    out = jax.block_until_ready(residual_connect(inputs, residual))
    ref = jnp.maximum(inputs + residual, 0)
    assert out.shape == ref.shape
    assert jnp.allclose(out, ref, atol=1e-6, rtol=1e-6), "mismatch (small path)"

    # Ragged shape (n not a multiple of 128): exercises the no-pad divisor path.
    x2 = jax.random.normal(k3, (3, 5, 70, 33), dtype=jnp.float32)
    r2 = jax.random.normal(k4, (3, 5, 70, 33), dtype=jnp.float32)
    out2 = jax.block_until_ready(residual_connect(x2, r2))
    ref2 = jnp.maximum(x2 + r2, 0)
    assert out2.shape == ref2.shape
    assert jnp.allclose(out2, ref2, atol=1e-6, rtol=1e-6), "mismatch (ragged path)"

    # Larger shape (>512 KiB): exercises the gridded / parallel pipeline path.
    x3 = jax.random.normal(k5, (4, 8, 64, 128), dtype=jnp.float32)
    r3 = jax.random.normal(k6, (4, 8, 64, 128), dtype=jnp.float32)
    out3 = jax.block_until_ready(residual_connect(x3, r3))
    ref3 = jnp.maximum(x3 + r3, 0)
    assert out3.shape == ref3.shape
    assert jnp.allclose(out3, ref3, atol=1e-6, rtol=1e-6), "mismatch (grid path)"

    print("KERNEL_OK")
</pallas_src>

<mosaic_0001>
module attributes {stable_mosaic.version = 11 : i64} {
  func.func @_residual_connect_kernel(%arg0: memref<2x1024xf32, #tpu.memory_space<vmem>>, %arg1: memref<2x1024xf32, #tpu.memory_space<vmem>>, %arg2: memref<2x1024xf32, #tpu.memory_space<vmem>>) attributes {dimension_semantics = [], scalar_prefetch = 0 : i64, scratch_operands = 0 : i64, tpu.core_type = #tpu.core_type<tc>} {
    %c0 = arith.constant 0 : index
    %c0_0 = arith.constant 0 : index
    %0 = vector.load %arg0[%c0, %c0_0] : memref<2x1024xf32, #tpu.memory_space<vmem>>, vector<2x1024xf32>
    %c0_1 = arith.constant 0 : index
    %c0_2 = arith.constant 0 : index
    %1 = vector.load %arg1[%c0_1, %c0_2] : memref<2x1024xf32, #tpu.memory_space<vmem>>, vector<2x1024xf32>
    %2 = arith.addf %0, %1 : vector<2x1024xf32>
    %cst = arith.constant 0.000000e+00 : f32
    %3 = vector.broadcast %cst : f32 to vector<2x1024xf32>
    %4 = arith.maximumf %2, %3 : vector<2x1024xf32>
    %c0_3 = arith.constant 0 : index
    %c0_4 = arith.constant 0 : index
    %5 = vector.load %arg2[%c0_3, %c0_4] : memref<2x1024xf32, #tpu.memory_space<vmem>>, vector<2x1024xf32>
    tpu.vector_store %arg2[%c0_3, %c0_4], %4 {strides = array<i32>} : memref<2x1024xf32, #tpu.memory_space<vmem>>, vector<2x1024xf32>,
    return
  }
}

</mosaic_0001>

<bundles_post_ra>
// kernel: tpu_custom_call.1
= control target key start
LH: loop header
LB: loop body
LE: loop exit
PB: predicated region body
PF: predicated region fallthrough
CT: control target
= control target key end

     0   :  { %7 = vsyncpa [#allocation3], 0  ;;  %s176_s0 = inlined_call_operand.hbm [shape: f32[2,1024], index: 0, kind: input, shape index: {}]   ;;  %s177_s1 = inlined_call_operand.hbm [shape: f32[2,1024], index: 1, kind: input, shape index: {}]   ;;  %s178_s2 = inlined_call_operand.hbm [shape: f32[2,1024], index: 2, kind: output, shape index: {}]  }
   0x1   :  { %8 = vsyncpa [#allocation6], 0 }
   0x2   :  { %9 = vsyncpa [#allocation4], 0  ;;  %s15_s11 = sshll.u32 %s176_s0, 4  ;;  %s149_s12 = smov [#allocation2]   ;;  %s16_s11 = int_to_ptr.hbm [resolvable:$true] %s15_s11 }
   0x3   :  { %s17_s13 = sshll.u32 %s149_s12, 4  ;;  %s26_s16 = sshll.u32 %s177_s1, 4  ;;  %s18_s13 = int_to_ptr.vmem [resolvable:$true] %s17_s13  ;;  %s27_s16 = int_to_ptr.hbm [resolvable:$true] %s26_s16 }
   0x4   :  { %20 = dma.hbm_to_vmem [thread:$0]  %s16_s11, 256, %s18_s13, [#allocation3]  }
   0x5   :  { %s150_s17 = smov [#allocation5]  }
   0x6   :  { %s28_s18 = sshll.u32 %s150_s17, 4  ;;  %s29_s18 = int_to_ptr.vmem [resolvable:$true] %s28_s18 }
   0x7   :  { %31 = dma.hbm_to_vmem [thread:$0]  %s27_s16, 256, %s29_s18, [#allocation6]  }
   0x8   :  { %143 = dma.done.wait [#allocation3], 256  }
   0x9   :  { %144 = vsyncadd [#allocation3], 4294967040 }
   0xa   :  { %145 = dma.done.wait [#allocation6], 256  }
   0xb   :  { %146 = vsyncadd [#allocation6], 4294967040  ;;  %v40_v0 = vld [vmem:[#allocation2] sm:$0xff]  ;;  %v42_v1 = vld [vmem:[#allocation5] sm:$0xff]  ;;  %s151_s0 = smov [#allocation7]   ;;  %s57_s1 = sshll.u32 %s178_s2, 4  ;;  %s58_s1 = int_to_ptr.hbm [resolvable:$true] %s57_s1 }
   0xc   :  { %v41_v2 = vld [vmem:[#allocation2 + $0x8] sm:$0xff]  ;;  %v44_v3 = vadd.f32 %v42_v1, %v40_v0  ;;  %v43_v4 = vld [vmem:[#allocation5 + $0x8] sm:$0xff]  ;;  %s55_s19 = sshll.u32 %s151_s0, 4  ;;  %s56_s19 = int_to_ptr.vmem [resolvable:$true] %s55_s19 }
   0xd   :  { %v45_v5 = vadd.f32 %v43_v4, %v41_v2 }
   0xe   :  { %v46_v6 = vmax.f32 %v44_v3, 0.0 }
   0xf   :  { %v47_v7 = vmax.f32 %v45_v5, 0.0 }
  0x10   :  { %48 = vst [vmem:[#allocation7] sm:$0xff] %v46_v6 }
  0x11   :  { %49 = vst [vmem:[#allocation7 + $0x8] sm:$0xff] %v47_v7 }
  0x12   :  { %60 = dma.vmem_to_hbm [thread:$0]  %s56_s19, 256, %s58_s1, [#allocation4]  }
  0x13   :  { %147 = dma.done.wait [#allocation4], 256  }
  0x14   :  { %148 = vsyncadd [#allocation4], 4294967040 }
  0x15   :  { %65 = vsyncpa [#allocation3], 1 }
  0x16   :  { %66 = vsyncpa [#allocation6], 1 }
  0x17   :  { %67 = vsyncpa [#allocation4], 1 }

</bundles_post_ra>
